<compile_context>
chip_gen: v5e
topology: v5e:2x2
jax: 0.10.0
libtpu: 0.0.40
codegen_flags: <defaults>
</compile_context>

<pallas_src>
import jax
import jax.numpy as jnp
from jax import lax
from jax.experimental import pallas as pl
from jax.experimental.pallas import tpu as pltpu  # noqa: F401  (no TPU-specific params needed)


def _conv1x1_kernel(w_ref, x_ref, o_ref):
    # w_ref: (Cout, Cin)  bf16 weights in their native layout (prepped once)
    # x_ref: (Cin, M)     f32 activations, M = N*H*W (channel-major; free reshape for N=1)
    # o_ref: (Cout, M)    f32 output; for N=1 this reshapes to NCHW for free
    x_bf16 = x_ref[...].astype(jnp.bfloat16)  # VPU cast, hidden under the MXU matmul
    o_ref[...] = lax.dot_general(
        w_ref[...],
        x_bf16,
        dimension_numbers=(((1,), (0,)), ((), ())),  # (Cout,Cin) @ (Cin,M) -> (Cout,M)
        preferred_element_type=jnp.float32,           # f32 MXU accumulation
    ).astype(o_ref.dtype)


def prepare_weight(weight_oihw: jax.Array) -> jax.Array:
    """One-time parameter prep: (Cout, Cin, 1, 1) -> (Cout, Cin) in bf16.

    Pure reshape (no transpose) + cast; in a real model this is constant-folded
    / done at load time, NOT per forward call.
    """
    cout, cin = weight_oihw.shape[0], weight_oihw.shape[1]
    return weight_oihw.reshape(cout, cin).astype(jnp.bfloat16)


def conv1x1_pallas(x_nchw: jax.Array, w_oc_bf16: jax.Array) -> jax.Array:
    """1x1 conv, stride 1, no bias. x: (N, Cin, H, W), w_oc_bf16: (Cout, Cin) bf16."""
    n, cin, h, w = x_nchw.shape
    cout = w_oc_bf16.shape[0]
    m = n * h * w

    # Activations: NCHW -> (Cin, M). For n == 1 this is a pure reshape (free).
    if n == 1:
        x_cm = x_nchw.reshape(cin, h * w)
    else:
        # TODO(synk): batched callers pay a real transpose here; prefer an
        # NHWC / channel-major producer or a grid over M in that regime.
        x_cm = jnp.transpose(x_nchw.reshape(n, cin, h * w), (1, 0, 2)).reshape(cin, m)

    cost = pl.CostEstimate(
        flops=2 * m * cin * cout,
        transcendentals=0,
        bytes_accessed=(cin * m * 4) + (cin * cout * 2) + (m * cout * 4),
    )

    out_cm = pl.pallas_call(
        _conv1x1_kernel,
        out_shape=jax.ShapeDtypeStruct((cout, m), x_nchw.dtype),
        in_specs=[
            pl.BlockSpec((cout, cin), lambda: (0, 0)),
            pl.BlockSpec((cin, m), lambda: (0, 0)),
        ],
        out_specs=pl.BlockSpec((cout, m), lambda: (0, 0)),
        cost_estimate=cost,
    )(w_oc_bf16, x_cm)

    # (Cout, M) -> NCHW.  Free reshape for N == 1; no transpose on the hot path.
    if n == 1:
        return out_cm.reshape(1, cout, h, w)
    return jnp.transpose(out_cm.reshape(cout, n, h, w), (1, 0, 2, 3))


if __name__ == "__main__":
    # Shapes implied by the module: input (1, 1024, 7, 7), weight (128, 1024, 1, 1)
    key = jax.random.PRNGKey(0)
    kx, kw = jax.random.split(key)

    N, CIN, H, W = 1, 1024, 7, 7
    COUT = 128

    x = jax.random.normal(kx, (N, CIN, H, W), dtype=jnp.float32)
    # Deterministic "kaiming-uniform-like" init (bound = 1/sqrt(fan_in))
    bound = 1.0 / jnp.sqrt(jnp.float32(CIN))
    weight = jax.random.uniform(
        kw, (COUT, CIN, 1, 1), dtype=jnp.float32, minval=-bound, maxval=bound
    )

    # One-time parameter prep (outside the per-call path).
    w_prepped = jax.block_until_ready(prepare_weight(weight))

    y = conv1x1_pallas(x, w_prepped)
    y = jax.block_until_ready(y)
    assert y.shape == (N, COUT, H, W), y.shape

    # Reference matching the kernel's bf16-operand / f32-accumulate semantics.
    x_bf = x.astype(jnp.bfloat16).astype(jnp.float32)
    w_bf = weight.reshape(COUT, CIN).astype(jnp.bfloat16).astype(jnp.float32)
    y_ref = jnp.einsum("nchw,oc->nohw", x_bf, w_bf)
    assert jnp.allclose(y, y_ref, atol=1e-2, rtol=1e-2)

    # Looser sanity check against the exact f32 conv (bf16 weight/act rounding).
    # TODO(synk): if bit-parity with the f32 PyTorch Conv2d is required, keep
    # both operands f32 in the kernel (accepting ~2x weight DMA).
    y_ref_f32 = jnp.einsum("nchw,oc->nohw", x, weight.reshape(COUT, CIN))
    assert jnp.allclose(y, y_ref_f32, atol=5e-2, rtol=5e-2)

    print("KERNEL_OK")
</pallas_src>

<mosaic_0001>
module attributes {stable_mosaic.version = 11 : i64} {
  func.func @_conv1x1_kernel(%arg0: memref<128x1024xbf16, #tpu.memory_space<vmem>>, %arg1: memref<1024x49xf32, #tpu.memory_space<vmem>>, %arg2: memref<128x49xf32, #tpu.memory_space<vmem>>) attributes {dimension_semantics = [], scalar_prefetch = 0 : i64, scratch_operands = 0 : i64, tpu.core_type = #tpu.core_type<tc>} {
    %c0 = arith.constant 0 : index
    %c0_0 = arith.constant 0 : index
    %0 = vector.load %arg1[%c0, %c0_0] : memref<1024x49xf32, #tpu.memory_space<vmem>>, vector<1024x49xf32>
    %1 = arith.truncf %0 : vector<1024x49xf32> to vector<1024x49xbf16>
    %c0_1 = arith.constant 0 : index
    %c0_2 = arith.constant 0 : index
    %2 = vector.load %arg0[%c0_1, %c0_2] : memref<128x1024xbf16, #tpu.memory_space<vmem>>, vector<128x1024xbf16>
    %cst = arith.constant dense<0.000000e+00> : vector<128x49xf32>
    %3 = tpu.matmul %2, %1, %cst {dimension_numbers = #tpu.dot_dimension_numbers<[1], [0], [0], [1], [0, 0, 1, 1], [], []>} : vector<128x1024xbf16>, vector<1024x49xbf16>, vector<128x49xf32> -> vector<128x49xf32>
    %c0_3 = arith.constant 0 : index
    %c0_4 = arith.constant 0 : index
    %4 = vector.load %arg2[%c0_3, %c0_4] : memref<128x49xf32, #tpu.memory_space<vmem>>, vector<128x49xf32>
    tpu.vector_store %arg2[%c0_3, %c0_4], %3 {strides = array<i32>} : memref<128x49xf32, #tpu.memory_space<vmem>>, vector<128x49xf32>,
    return
  }
}

</mosaic_0001>

<bundles_post_ra>
// kernel: tpu_custom_call.1
= control target key start
LH: loop header
LB: loop body
LE: loop exit
PB: predicated region body
PF: predicated region fallthrough
CT: control target
= control target key end

     0   :  { %vm979_vm0 = vcmask 400384   ;;  %s2215_s1 = inlined_call_operand.vmem [shape: f32[1024,49], index: 1, kind: input, shape index: {}]   ;;  %s2216_s0 = inlined_call_operand.vmem [shape: bf16[128,1024], index: 0, kind: input, shape index: {}]   ;;  %s2217_s2 = inlined_call_operand.vmem [shape: f32[128,49], index: 2, kind: output, shape index: {}]  }
   0x1   :  { %v25_v0 = vld [vmem:[%s2215_s1 + $0x70] sm:$0xff]  ;;  %v26_v1 = vld [vmem:[%s2215_s1 + $0x78] sm:$0xff]  ;;  %v23_v11 = vld [vmem:[%s2215_s1 + $0x60] sm:$0xff] }
   0x2   :  { %v41_v2 = vld [vmem:[%s2215_s1 + $0xf0] sm:$0xff]  ;;  %v146_v3 = vpack.c.bf16 %v26_v1, %v25_v0  ;;  %v42_v4 = vld [vmem:[%s2215_s1 + $0xf8] sm:$0xff]  ;;  %v24_v13 = vld [vmem:[%s2215_s1 + $0x68] sm:$0xff] }
   0x3   :  { %v57_v5 = vld [vmem:[%s2215_s1 + $0x170] sm:$0xff]  ;;  %v58_v6 = vld [vmem:[%s2215_s1 + $0x178] sm:$0xff]  ;;  %v154_v7 = vpack.c.bf16 %v42_v4, %v41_v2  ;;  %v39_v14 = vld [vmem:[%s2215_s1 + $0xe0] sm:$0xff]  ;;  %v145_v16 = vpack.c.bf16 %v24_v13, %v23_v11 }
   0x4   :  { %v162_v8 = vpack.c.bf16 %v58_v6, %v57_v5  ;;  %v73_v9 = vld [vmem:[%s2215_s1 + $0x1f0] sm:$0xff]  ;;  %v74_v10 = vld [vmem:[%s2215_s1 + $0x1f8] sm:$0xff]  ;;  %587 = vmatpush.bf16.msra.mxu0 %v146_v3  ;;  %v40_v15 = vld [vmem:[%s2215_s1 + $0xe8] sm:$0xff] }
   0x5   :  { %v170_v12 = vpack.c.bf16 %v74_v10, %v73_v9  ;;  %636 = vmatpush.bf16.msra.mxu1 %v154_v7  ;;  %v153_v17 = vpack.c.bf16 %v40_v15, %v39_v14  ;;  %v55_v18 = vld [vmem:[%s2215_s1 + $0x160] sm:$0xff]  ;;  %v56_v19 = vld [vmem:[%s2215_s1 + $0x168] sm:$0xff]  ;;  %v21_v23 = vld [vmem:[%s2215_s1 + $0x50] sm:$0xff] }
   0x6   :  { %685 = vmatpush.bf16.msra.mxu2 %v162_v8  ;;  %v71_v20 = vld [vmem:[%s2215_s1 + $0x1e0] sm:$0xff]  ;;  %v161_v21 = vpack.c.bf16 %v56_v19, %v55_v18  ;;  %v72_v22 = vld [vmem:[%s2215_s1 + $0x1e8] sm:$0xff]  ;;  %v22_v24 = vld [vmem:[%s2215_s1 + $0x58] sm:$0xff] }
   0x7   :  { %734 = vmatpush.bf16.msra.mxu3 %v170_v12  ;;  %v169_v25 = vpack.c.bf16 %v72_v22, %v71_v20  ;;  %v37_v26 = vld [vmem:[%s2215_s1 + $0xd0] sm:$0xff]  ;;  %v38_v27 = vld [vmem:[%s2215_s1 + $0xd8] sm:$0xff]  ;;  %v144_v29 = vpack.c.bf16 %v22_v24, %v21_v23  ;;  %v19_v35 = vld [vmem:[%s2215_s1 + $0x40] sm:$0xff] }
   0x8   :  { %v53_v28 = vld [vmem:[%s2215_s1 + $0x150] sm:$0xff]  ;;  %588 = vmatpush.bf16.msra.mxu0 %v145_v16  ;;  %v54_v30 = vld [vmem:[%s2215_s1 + $0x158] sm:$0xff]  ;;  %v152_v33 = vpack.c.bf16 %v38_v27, %v37_v26  ;;  %v20_v36 = vld [vmem:[%s2215_s1 + $0x48] sm:$0xff] }
   0x9   :  { %v69_v31 = vld [vmem:[%s2215_s1 + $0x1d0] sm:$0xff]  ;;  %v70_v32 = vld [vmem:[%s2215_s1 + $0x1d8] sm:$0xff]  ;;  %637 = vmatpush.bf16.msra.mxu1 %v153_v17  ;;  %v160_v34 = vpack.c.bf16 %v54_v30, %v53_v28  ;;  %v35_v37 = vld [vmem:[%s2215_s1 + $0xc0] sm:$0xff]  ;;  %v143_v44 = vpack.c.bf16 %v20_v36, %v19_v35 }
   0xa   :  { %686 = vmatpush.bf16.msra.mxu2 %v161_v21  ;;  %v168_v38 = vpack.c.bf16 %v70_v32, %v69_v31  ;;  %v36_v39 = vld [vmem:[%s2215_s1 + $0xc8] sm:$0xff]  ;;  %v51_v40 = vld [vmem:[%s2215_s1 + $0x140] sm:$0xff]  ;;  %v17_v47 = vld [vmem:[%s2215_s1 + $0x30] sm:$0xff] }
   0xb   :  { %735 = vmatpush.bf16.msra.mxu3 %v169_v25  ;;  %v52_v41 = vld [vmem:[%s2215_s1 + $0x148] sm:$0xff]  ;;  %v67_v42 = vld [vmem:[%s2215_s1 + $0x1c0] sm:$0xff]  ;;  %v151_v45 = vpack.c.bf16 %v36_v39, %v35_v37  ;;  %v18_v48 = vld [vmem:[%s2215_s1 + $0x38] sm:$0xff] }
   0xc   :  { %v68_v43 = vld [vmem:[%s2215_s1 + $0x1c8] sm:$0xff]  ;;  %589 = vmatpush.bf16.msra.mxu0 %v144_v29  ;;  %v159_v46 = vpack.c.bf16 %v52_v41, %v51_v40  ;;  %v33_v49 = vld [vmem:[%s2215_s1 + $0xb0] sm:$0xff]  ;;  %v34_v51 = vld [vmem:[%s2215_s1 + $0xb8] sm:$0xff]  ;;  %v142_v56 = vpack.c.bf16 %v18_v48, %v17_v47 }
   0xd   :  { %638 = vmatpush.bf16.msra.mxu1 %v152_v33  ;;  %v167_v50 = vpack.c.bf16 %v68_v43, %v67_v42  ;;  %v49_v52 = vld [vmem:[%s2215_s1 + $0x130] sm:$0xff]  ;;  %v50_v53 = vld [vmem:[%s2215_s1 + $0x138] sm:$0xff]  ;;  %v150_v57 = vpack.c.bf16 %v34_v51, %v33_v49  ;;  %v15_v59 = vld [vmem:[%s2215_s1 + $0x20] sm:$0xff] }
   0xe   :  { %687 = vmatpush.bf16.msra.mxu2 %v160_v34  ;;  %v65_v54 = vld [vmem:[%s2215_s1 + $0x1b0] sm:$0xff]  ;;  %v66_v55 = vld [vmem:[%s2215_s1 + $0x1b8] sm:$0xff]  ;;  %v158_v58 = vpack.c.bf16 %v50_v53, %v49_v52  ;;  %v16_v60 = vld [vmem:[%s2215_s1 + $0x28] sm:$0xff] }
   0xf   :  { %736 = vmatpush.bf16.msra.mxu3 %v168_v38  ;;  %v31_v61 = vld [vmem:[%s2215_s1 + $0xa0] sm:$0xff]  ;;  %v166_v62 = vpack.c.bf16 %v66_v55, %v65_v54  ;;  %v32_v63 = vld [vmem:[%s2215_s1 + $0xa8] sm:$0xff]  ;;  %v141_v4 = vpack.c.bf16 %v16_v60, %v15_v59  ;;  %v13_v7 = vld [vmem:[%s2215_s1 + $0x10] sm:$0xff] }
  0x10   :  { %590 = vmatpush.bf16.msra.mxu0 %v143_v44  ;;  %v47_v0 = vld [vmem:[%s2215_s1 + $0x120] sm:$0xff]  ;;  %v48_v1 = vld [vmem:[%s2215_s1 + $0x128] sm:$0xff]  ;;  %v149_v5 = vpack.c.bf16 %v32_v63, %v31_v61  ;;  %v14_v8 = vld [vmem:[%s2215_s1 + $0x18] sm:$0xff] }
  0x11   :  { %639 = vmatpush.bf16.msra.mxu1 %v151_v45  ;;  %v63_v2 = vld [vmem:[%s2215_s1 + $0x1a0] sm:$0xff]  ;;  %v64_v3 = vld [vmem:[%s2215_s1 + $0x1a8] sm:$0xff]  ;;  %v157_v6 = vpack.c.bf16 %v48_v1, %v47_v0  ;;  %v29_v9 = vld [vmem:[%s2215_s1 + $0x90] sm:$0xff]  ;;  %v140_v17 = vpack.c.bf16 %v14_v8, %v13_v7 }
  0x12   :  { %688 = vmatpush.bf16.msra.mxu2 %v159_v46  ;;  %v165_v10 = vpack.c.bf16 %v64_v3, %v63_v2  ;;  %v30_v11 = vld [vmem:[%s2215_s1 + $0x98] sm:$0xff]  ;;  %v45_v12 = vld [vmem:[%s2215_s1 + $0x110] sm:$0xff]  ;;  %v11_v16 = vld [vmem:[%s2215_s1] sm:$0xff] }
  0x13   :  { %737 = vmatpush.bf16.msra.mxu3 %v167_v50  ;;  %v46_v13 = vld [vmem:[%s2215_s1 + $0x118] sm:$0xff]  ;;  %v61_v14 = vld [vmem:[%s2215_s1 + $0x190] sm:$0xff]  ;;  %v12_v18 = vld [vmem:[%s2215_s1 + $0x8] sm:$0xff]  ;;  %v148_v21 = vpack.c.bf16 %v30_v11, %v29_v9 }
  0x14   :  { %591 = vmatpush.bf16.msra.mxu0 %v142_v56  ;;  %v62_v15 = vld [vmem:[%s2215_s1 + $0x198] sm:$0xff]  ;;  %v27_v19 = vld [vmem:[%s2215_s1 + $0x80] sm:$0xff]  ;;  %v28_v20 = vld [vmem:[%s2215_s1 + $0x88] sm:$0xff]  ;;  %v156_v22 = vpack.c.bf16 %v46_v13, %v45_v12  ;;  %v139_v34 = vpack.c.bf16 %v12_v18, %v11_v16 }
  0x15   :  { %640 = vmatpush.bf16.msra.mxu1 %v150_v57  ;;  %v43_v23 = vld [vmem:[%s2215_s1 + $0x100] sm:$0xff]  ;;  %v44_v24 = vld [vmem:[%s2215_s1 + $0x108] sm:$0xff]  ;;  %v164_v26 = vpack.c.bf16 %v62_v15, %v61_v14  ;;  %v121_v32 = vld [vmem:[%s2215_s1 + $0x370] sm:$0xff]  ;;  %v147_v38 = vpack.c.bf16 %v28_v20, %v27_v19 }
  0x16   :  { %689 = vmatpush.bf16.msra.mxu2 %v158_v58  ;;  %v59_v25 = vld [vmem:[%s2215_s1 + $0x180] sm:$0xff]  ;;  %v60_v27 = vld [vmem:[%s2215_s1 + $0x188] sm:$0xff]  ;;  %v122_v33 = vld [vmem:[%s2215_s1 + $0x378] sm:$0xff]  ;;  %v155_v39 = vpack.c.bf16 %v44_v24, %v43_v23 }
  0x17   :  { %738 = vmatpush.bf16.msra.mxu3 %v166_v62  ;;  %v1002_v28 = vld [vmem:[%s2216_s0] sm:$0xf]  ;;  %v1256_v30 = vld [vmem:[%s2216_s0 + $0x4] sm:$0xf]  ;;  %v1010_v35 = vld [vmem:[%s2216_s0 + $0x8] sm:$0xf]  ;;  %v163_v43 = vpack.c.bf16 %v60_v27, %v59_v25  ;;  %v194_v44 = vpack.c.bf16 %v122_v33, %v121_v32 }
  0x18   :  { %592 = vmatpush.bf16.msra.mxu0 %v141_v4  ;;  %v1260_v29 = vld [vmem:[%s2216_s0 + $0x1c] sm:$0xf0]  ;;  %v1004_v31 = vld [vmem:[%s2216_s0 + $0x20] sm:$0xf0]  ;;  %v137_v36 = vld [vmem:[%s2215_s1 + $0x3f0] sm:$0xff] }
  0x19   :  { %641 = vmatpush.bf16.msra.mxu1 %v149_v5  ;;  %v138_v37 = vld [vmem:[%s2215_s1 + $0x3f8] sm:$0xff]  ;;  %v1261_v40 = vld [vmem:[%s2216_s0 + $0x24] sm:$0xf0]  ;;  %v1257_v41 = vld [vmem:[%s2216_s0 + $0xc] sm:$0xf]  ;;  %v1003_v48 = vor.u32 %v1260_v29, %v1002_v28  ;;  %v1007_v53 = vor.u32 %v1256_v30, %v1004_v31 }
  0x1a   :  { %690 = vmatpush.bf16.msra.mxu2 %v157_v6  ;;  %v1012_v42 = vld [vmem:[%s2216_s0 + $0x28] sm:$0xf0]  ;;  %v89_v45 = vld [vmem:[%s2215_s1 + $0x270] sm:$0xff]  ;;  %v90_v46 = vld [vmem:[%s2215_s1 + $0x278] sm:$0xff]  ;;  %v202_v49 = vpack.c.bf16 %v138_v37, %v137_v36  ;;  %v1011_v54 = vor.u32 %v1261_v40, %v1010_v35 }
  0x1b   :  { %739 = vmatpush.bf16.msra.mxu3 %v165_v10  ;;  %v105_v47 = vld [vmem:[%s2215_s1 + $0x2f0] sm:$0xff]  ;;  %v106_v50 = vld [vmem:[%s2215_s1 + $0x2f8] sm:$0xff]  ;;  %v119_v51 = vld [vmem:[%s2215_s1 + $0x360] sm:$0xff]  ;;  %v1015_v57 = vor.u32 %v1257_v41, %v1012_v42  ;;  %v178_v58 = vpack.c.bf16 %v90_v46, %v89_v45 }
  0x1c   :  { %593 = vmatpush.bf16.msra.mxu0 %v140_v17  ;;  %v120_v52 = vld [vmem:[%s2215_s1 + $0x368] sm:$0xff]  ;;  %v135_v55 = vld [vmem:[%s2215_s1 + $0x3e0] sm:$0xff]  ;;  %v186_v59 = vpack.c.bf16 %v106_v50, %v105_v47  ;;  %v117_v3 = vld [vmem:[%s2215_s1 + $0x350] sm:$0xff] }
  0x1d   :  { %642 = vmatpush.bf16.msra.mxu1 %v148_v21  ;;  %v136_v56 = vld [vmem:[%s2215_s1 + $0x3e8] sm:$0xff]  ;;  %v193_v60 = vpack.c.bf16 %v120_v52, %v119_v51  ;;  %v87_v61 = vld [vmem:[%s2215_s1 + $0x260] sm:$0xff]  ;;  %v118_v4 = vld [vmem:[%s2215_s1 + $0x358] sm:$0xff] }
  0x1e   :  { %691 = vmatpush.bf16.msra.mxu2 %v156_v22  ;;  %v88_v62 = vld [vmem:[%s2215_s1 + $0x268] sm:$0xff]  ;;  %v201_v63 = vpack.c.bf16 %v136_v56, %v135_v55  ;;  %v103_v0 = vld [vmem:[%s2215_s1 + $0x2e0] sm:$0xff]  ;;  %v85_v5 = vld [vmem:[%s2215_s1 + $0x250] sm:$0xff]  ;;  %v192_v7 = vpack.c.bf16 %v118_v4, %v117_v3 }
  0x1f   :  { %740 = vmatpush.bf16.msra.mxu3 %v164_v26  ;;  %v104_v1 = vld [vmem:[%s2215_s1 + $0x2e8] sm:$0xff]  ;;  %v177_v2 = vpack.c.bf16 %v88_v62, %v87_v61  ;;  %v86_v8 = vld [vmem:[%s2215_s1 + $0x258] sm:$0xff]  ;;  %v133_v9 = vld [vmem:[%s2215_s1 + $0x3d0] sm:$0xff] }
  0x20   :  { %594 = vmatpush.bf16.msra.mxu0 %v139_v34  ;;  %v185_v6 = vpack.c.bf16 %v104_v1, %v103_v0  ;;  %v134_v10 = vld [vmem:[%s2215_s1 + $0x3d8] sm:$0xff]  ;;  %v101_v12 = vld [vmem:[%s2215_s1 + $0x2d0] sm:$0xff]  ;;  %v176_v14 = vpack.c.bf16 %v86_v8, %v85_v5  ;;  %v1034_v16 = vld [vmem:[%s2216_s0 + $0x40] sm:$0xf] }
  0x21   :  { %643 = vmatpush.bf16.msra.mxu1 %v147_v38  ;;  %v200_v11 = vpack.c.bf16 %v134_v10, %v133_v9  ;;  %v102_v13 = vld [vmem:[%s2215_s1 + $0x2d8] sm:$0xff]  ;;  %v1268_v17 = vld [vmem:[%s2216_s0 + $0x5c] sm:$0xf0]  ;;  %v1264_v18 = vld [vmem:[%s2216_s0 + $0x44] sm:$0xf] }
  0x22   :  { %692 = vmatpush.bf16.msra.mxu2 %v155_v39  ;;  %v184_v15 = vpack.c.bf16 %v102_v13, %v101_v12  ;;  %v1036_v19 = vld [vmem:[%s2216_s0 + $0x60] sm:$0xf0]  ;;  %v1042_v20 = vld [vmem:[%s2216_s0 + $0x48] sm:$0xf]  ;;  %v1265_v22 = vld [vmem:[%s2216_s0 + $0x4c] sm:$0xf]  ;;  %v1035_v24 = vor.u32 %v1268_v17, %v1034_v16 }
  0x23   :  { %741 = vmatpush.bf16.msra.mxu3 %v163_v43  ;;  %595 = vmatmul.bf16.vlgmr.msra.gmra.mxu0 %v1003_v48  ;;  %v1269_v21 = vld [vmem:[%s2216_s0 + $0x64] sm:$0xf0]  ;;  %v1044_v23 = vld [vmem:[%s2216_s0 + $0x68] sm:$0xf0]  ;;  %v1039_v25 = vor.u32 %v1264_v18, %v1036_v19  ;;  %v115_v28 = vld [vmem:[%s2215_s1 + $0x340] sm:$0xff] }
  0x24   :  { %644 = vmatmul.bf16.vlgmr.msra.gmra.mxu1 %v1007_v53  ;;  %783 = vmatpush.bf16.msrb.mxu0 %v178_v58  ;;  %v1043_v26 = vor.u32 %v1269_v21, %v1042_v20  ;;  %v1047_v27 = vor.u32 %v1265_v22, %v1044_v23  ;;  %v116_v29 = vld [vmem:[%s2215_s1 + $0x348] sm:$0xff]  ;;  %v83_v30 = vld [vmem:[%s2215_s1 + $0x240] sm:$0xff]  ;;  %v113_v52 = vld [vmem:[%s2215_s1 + $0x330] sm:$0xff] }
  0x25   :  { %693 = vmatmul.bf16.vlgmr.msra.gmra.mxu2 %v1011_v54  ;;  %832 = vmatpush.bf16.msrb.mxu1 %v186_v59  ;;  %v191_v31 = vpack.c.bf16 %v116_v29, %v115_v28  ;;  %v84_v32 = vld [vmem:[%s2215_s1 + $0x248] sm:$0xff]  ;;  %v131_v33 = vld [vmem:[%s2215_s1 + $0x3c0] sm:$0xff]  ;;  %v114_v53 = vld [vmem:[%s2215_s1 + $0x338] sm:$0xff] }
  0x26   :  { %881 = vmatpush.bf16.msrb.mxu2 %v194_v44  ;;  %742 = vmatmul.bf16.vlgmr.msra.gmra.mxu3 %v1015_v57  ;;  %v132_v34 = vld [vmem:[%s2215_s1 + $0x3c8] sm:$0xff]  ;;  %v175_v35 = vpack.c.bf16 %v84_v32, %v83_v30  ;;  %v99_v37 = vld [vmem:[%s2215_s1 + $0x2c0] sm:$0xff]  ;;  %v81_v54 = vld [vmem:[%s2215_s1 + $0x230] sm:$0xff]  ;;  %v190_v55 = vpack.c.bf16 %v114_v53, %v113_v52 }
  0x27   :  { %930 = vmatpush.bf16.msrb.mxu3 %v202_v49  ;;  %v199_v36 = vpack.c.bf16 %v132_v34, %v131_v33  ;;  %v100_v38 = vld [vmem:[%s2215_s1 + $0x2c8] sm:$0xff]  ;;  %v1066_v40 = vld [vmem:[%s2216_s0 + $0x80] sm:$0xf]  ;;  %v1272_v42 = vld [vmem:[%s2216_s0 + $0x84] sm:$0xf] }
  0x28   :  { %784 = vmatpush.bf16.msrb.mxu0 %v177_v2  ;;  %v183_v39 = vpack.c.bf16 %v100_v38, %v99_v37  ;;  %v1276_v41 = vld [vmem:[%s2216_s0 + $0x9c] sm:$0xf0]  ;;  %v1068_v43 = vld [vmem:[%s2216_s0 + $0xa0] sm:$0xf0]  ;;  %v1074_v44 = vld [vmem:[%s2216_s0 + $0x88] sm:$0xf] }
  0x29   :  { %833 = vmatpush.bf16.msrb.mxu1 %v185_v6  ;;  %v1277_v45 = vld [vmem:[%s2216_s0 + $0xa4] sm:$0xf0]  ;;  %v1273_v46 = vld [vmem:[%s2216_s0 + $0x8c] sm:$0xf]  ;;  %v1067_v48 = vor.u32 %v1276_v41, %v1066_v40  ;;  %v1071_v49 = vor.u32 %v1272_v42, %v1068_v43  ;;  %v82_v56 = vld [vmem:[%s2215_s1 + $0x238] sm:$0xff] }
  0x2a   :  { %882 = vmatpush.bf16.msrb.mxu2 %v193_v60  ;;  %v1076_v47 = vld [vmem:[%s2216_s0 + $0xa8] sm:$0xf0]  ;;  %v1075_v50 = vor.u32 %v1277_v45, %v1074_v44  ;;  %v129_v57 = vld [vmem:[%s2215_s1 + $0x3b0] sm:$0xff]  ;;  %v130_v58 = vld [vmem:[%s2215_s1 + $0x3b8] sm:$0xff]  ;;  %v174_v59 = vpack.c.bf16 %v82_v56, %v81_v54 }
  0x2b   :  { %931 = vmatpush.bf16.msrb.mxu3 %v201_v63  ;;  %v1079_v51 = vor.u32 %v1273_v46, %v1076_v47  ;;  %v198_v60 = vpack.c.bf16 %v130_v58, %v129_v57  ;;  %v97_v61 = vld [vmem:[%s2215_s1 + $0x2b0] sm:$0xff]  ;;  %v98_v62 = vld [vmem:[%s2215_s1 + $0x2b8] sm:$0xff]  ;;  %v1098_v0 = vld [vmem:[%s2216_s0 + $0xc0] sm:$0xf] }
  0x2c   :  { %785 = vmatpush.bf16.msrb.mxu0 %v176_v14  ;;  %v182_v63 = vpack.c.bf16 %v98_v62, %v97_v61  ;;  %v1284_v1 = vld [vmem:[%s2216_s0 + $0xdc] sm:$0xf0]  ;;  %v1280_v2 = vld [vmem:[%s2216_s0 + $0xc4] sm:$0xf]  ;;  %v1106_v4 = vld [vmem:[%s2216_s0 + $0xc8] sm:$0xf] }
  0x2d   :  { %834 = vmatpush.bf16.msrb.mxu1 %v184_v15  ;;  %v1100_v3 = vld [vmem:[%s2216_s0 + $0xe0] sm:$0xf0]  ;;  %v1285_v5 = vld [vmem:[%s2216_s0 + $0xe4] sm:$0xf0]  ;;  %v1281_v6 = vld [vmem:[%s2216_s0 + $0xcc] sm:$0xf]  ;;  %v1099_v8 = vor.u32 %v1284_v1, %v1098_v0 }
  0x2e   :  { %883 = vmatpush.bf16.msrb.mxu2 %v192_v7  ;;  %v1108_v7 = vld [vmem:[%s2216_s0 + $0xe8] sm:$0xf0]  ;;  %v1103_v9 = vor.u32 %v1280_v2, %v1100_v3  ;;  %v1107_v10 = vor.u32 %v1285_v5, %v1106_v4  ;;  %v111_v12 = vld [vmem:[%s2215_s1 + $0x320] sm:$0xff]  ;;  %v1138_v28 = vld [vmem:[%s2216_s0 + $0x108] sm:$0xf] }
  0x2f   :  { %932 = vmatpush.bf16.msrb.mxu3 %v200_v11  ;;  %v1111_v11 = vor.u32 %v1281_v6, %v1108_v7  ;;  %v112_v13 = vld [vmem:[%s2215_s1 + $0x328] sm:$0xff]  ;;  %v79_v14 = vld [vmem:[%s2215_s1 + $0x220] sm:$0xff]  ;;  %v110_v37 = vld [vmem:[%s2215_s1 + $0x318] sm:$0xff] }
  0x30   :  { %786 = vmatpush.bf16.msrb.mxu0 %v175_v35  ;;  %v189_v15 = vpack.c.bf16 %v112_v13, %v111_v12  ;;  %v80_v16 = vld [vmem:[%s2215_s1 + $0x228] sm:$0xff]  ;;  %v127_v17 = vld [vmem:[%s2215_s1 + $0x3a0] sm:$0xff]  ;;  %v77_v38 = vld [vmem:[%s2215_s1 + $0x210] sm:$0xff] }
  0x31   :  { %835 = vmatpush.bf16.msrb.mxu1 %v183_v39  ;;  %v128_v18 = vld [vmem:[%s2215_s1 + $0x3a8] sm:$0xff]  ;;  %v173_v19 = vpack.c.bf16 %v80_v16, %v79_v14  ;;  %v95_v21 = vld [vmem:[%s2215_s1 + $0x2a0] sm:$0xff]  ;;  %v78_v40 = vld [vmem:[%s2215_s1 + $0x218] sm:$0xff] }
  0x32   :  { %884 = vmatpush.bf16.msrb.mxu2 %v191_v31  ;;  %v197_v20 = vpack.c.bf16 %v128_v18, %v127_v17  ;;  %v96_v22 = vld [vmem:[%s2215_s1 + $0x2a8] sm:$0xff]  ;;  %v125_v41 = vld [vmem:[%s2215_s1 + $0x390] sm:$0xff]  ;;  %v126_v42 = vld [vmem:[%s2215_s1 + $0x398] sm:$0xff]  ;;  %v172_v43 = vpack.c.bf16 %v78_v40, %v77_v38 }
  0x33   :  { %600 = vmatmul.bf16.gmra.mxu0 %v1035_v24  ;;  %933 = vmatpush.bf16.msrb.mxu3 %v199_v36  ;;  %v181_v23 = vpack.c.bf16 %v96_v22, %v95_v21  ;;  %v1130_v24 = vld [vmem:[%s2216_s0 + $0x100] sm:$0xf]  ;;  %v1293_v29 = vld [vmem:[%s2216_s0 + $0x124] sm:$0xf0]  ;;  %v1289_v30 = vld [vmem:[%s2216_s0 + $0x10c] sm:$0xf]  ;;  %v196_v44 = vpack.c.bf16 %v126_v42, %v125_v41 }
  0x34   :  { %649 = vmatmul.bf16.gmra.mxu1 %v1039_v25  ;;  %787 = vmatpush.bf16.msrb.mxu0 %v174_v59  ;;  %v1292_v25 = vld [vmem:[%s2216_s0 + $0x11c] sm:$0xf0]  ;;  %v1140_v31 = vld [vmem:[%s2216_s0 + $0x128] sm:$0xf0]  ;;  %v1139_v34 = vor.u32 %v1293_v29, %v1138_v28  ;;  %v109_v36 = vld [vmem:[%s2215_s1 + $0x310] sm:$0xff] }
  0x35   :  { %698 = vmatmul.bf16.gmra.mxu2 %v1043_v26  ;;  %836 = vmatpush.bf16.msrb.mxu1 %v182_v63  ;;  %v1288_v26 = vld [vmem:[%s2216_s0 + $0x104] sm:$0xf]  ;;  %v1131_v32 = vor.u32 %v1292_v25, %v1130_v24  ;;  %v1143_v35 = vor.u32 %v1289_v30, %v1140_v31  ;;  %v188_v39 = vpack.c.bf16 %v110_v37, %v109_v36  ;;  %v93_v45 = vld [vmem:[%s2215_s1 + $0x290] sm:$0xff]  ;;  %v94_v46 = vld [vmem:[%s2215_s1 + $0x298] sm:$0xff] }
  0x36   :  { %747 = vmatmul.bf16.gmra.mxu3 %v1047_v27  ;;  %885 = vmatpush.bf16.msrb.mxu2 %v190_v55  ;;  %v1132_v27 = vld [vmem:[%s2216_s0 + $0x120] sm:$0xf0]  ;;  %v180_v47 = vpack.c.bf16 %v94_v46, %v93_v45  ;;  %v1170_v52 = vld [vmem:[%s2216_s0 + $0x148] sm:$0xf]  ;;  %v1297_v54 = vld [vmem:[%s2216_s0 + $0x14c] sm:$0xf] }
  0x37   :  { %934 = vmatpush.bf16.msrb.mxu3 %v198_v60  ;;  %v1135_v33 = vor.u32 %v1288_v26, %v1132_v27  ;;  %v1301_v53 = vld [vmem:[%s2216_s0 + $0x164] sm:$0xf0]  ;;  %v1172_v55 = vld [vmem:[%s2216_s0 + $0x168] sm:$0xf0]  ;;  %v107_v60 = vld [vmem:[%s2215_s1 + $0x300] sm:$0xff] }
  0x38   :  { %788 = vmatpush.bf16.msrb.mxu0 %v173_v19  ;;  %v1171_v58 = vor.u32 %v1301_v53, %v1170_v52  ;;  %v1175_v59 = vor.u32 %v1297_v54, %v1172_v55  ;;  %v108_v61 = vld [vmem:[%s2215_s1 + $0x308] sm:$0xff]  ;;  %v75_v62 = vld [vmem:[%s2215_s1 + $0x200] sm:$0xff]  ;;  %v1026_v36 = vld [vmem:[%s2216_s0 + $0x18] sm:$0xf] }
  0x39   :  { %837 = vmatpush.bf16.msrb.mxu1 %v181_v23  ;;  %v187_v63 = vpack.c.bf16 %v108_v61, %v107_v60  ;;  %v76_v0 = vld [vmem:[%s2215_s1 + $0x208] sm:$0xff]  ;;  %v123_v1 = vld [vmem:[%s2215_s1 + $0x380] sm:$0xff]  ;;  %v1263_v37 = vld [vmem:[%s2216_s0 + $0x34] sm:$0xf0] }
  0x3a   :  { %886 = vmatpush.bf16.msrb.mxu2 %v189_v15  ;;  %v124_v2 = vld [vmem:[%s2215_s1 + $0x388] sm:$0xff]  ;;  %v171_v3 = vpack.c.bf16 %v76_v0, %v75_v62  ;;  %v91_v5 = vld [vmem:[%s2215_s1 + $0x280] sm:$0xff]  ;;  %v1259_v38 = vld [vmem:[%s2216_s0 + $0x1c] sm:$0xf] }
  0x3b   :  { %935 = vmatpush.bf16.msrb.mxu3 %v197_v20  ;;  %v195_v4 = vpack.c.bf16 %v124_v2, %v123_v1  ;;  %v92_v6 = vld [vmem:[%s2215_s1 + $0x288] sm:$0xff]  ;;  %v1226_v20 = vld [vmem:[%s2216_s0 + $0x1c0] sm:$0xf]  ;;  %v1312_v22 = vld [vmem:[%s2216_s0 + $0x1c4] sm:$0xf] }
  0x3c   :  { %789 = vmatpush.bf16.msrb.mxu0 %v172_v43  ;;  %v179_v7 = vpack.c.bf16 %v92_v6, %v91_v5  ;;  %v1202_v12 = vld [vmem:[%s2216_s0 + $0x188] sm:$0xf]  ;;  %v1305_v14 = vld [vmem:[%s2216_s0 + $0x18c] sm:$0xf]  ;;  %v1316_v21 = vld [vmem:[%s2216_s0 + $0x1dc] sm:$0xf0]  ;;  %v1027_v43 = vor.u32 %v1263_v37, %v1026_v36 }
  0x3d   :  { %838 = vmatpush.bf16.msrb.mxu1 %v180_v47  ;;  %v1309_v13 = vld [vmem:[%s2216_s0 + $0x1a4] sm:$0xf0]  ;;  %v1204_v15 = vld [vmem:[%s2216_s0 + $0x1a8] sm:$0xf0]  ;;  %v1228_v23 = vld [vmem:[%s2216_s0 + $0x1e0] sm:$0xf0]  ;;  %v1227_v28 = vor.u32 %v1316_v21, %v1226_v20 }
  0x3e   :  { %887 = vmatpush.bf16.msrb.mxu2 %v188_v39  ;;  %v1203_v18 = vor.u32 %v1309_v13, %v1202_v12  ;;  %v1207_v19 = vor.u32 %v1305_v14, %v1204_v15  ;;  %v1234_v24 = vld [vmem:[%s2216_s0 + $0x1c8] sm:$0xf]  ;;  %v1313_v26 = vld [vmem:[%s2216_s0 + $0x1cc] sm:$0xf]  ;;  %v1231_v29 = vor.u32 %v1312_v22, %v1228_v23  ;;  %v1028_v39 = vld [vmem:[%s2216_s0 + $0x38] sm:$0xf0] }
  0x3f   :  { %936 = vmatpush.bf16.msrb.mxu3 %v196_v44  ;;  %v1317_v25 = vld [vmem:[%s2216_s0 + $0x1e4] sm:$0xf0]  ;;  %v1236_v27 = vld [vmem:[%s2216_s0 + $0x1e8] sm:$0xf0]  ;;  %v1031_v45 = vor.u32 %v1259_v38, %v1028_v39  ;;  %v1050_v54 = vld [vmem:[%s2216_s0 + $0x50] sm:$0xf] }
  0x40   :  { %790 = vmatpush.bf16.msrb.mxu0 %v171_v3  ;;  %v1235_v30 = vor.u32 %v1317_v25, %v1234_v24  ;;  %v1239_v31 = vor.u32 %v1313_v26, %v1236_v27  ;;  %v1270_v55 = vld [vmem:[%s2216_s0 + $0x6c] sm:$0xf0]  ;;  %v1267_v60 = vld [vmem:[%s2216_s0 + $0x5c] sm:$0xf]  ;;  %v1090_v20 = vld [vmem:[%s2216_s0 + $0x98] sm:$0xf] }
  0x41   :  { %839 = vmatpush.bf16.msrb.mxu1 %v179_v7  ;;  %v1060_v61 = vld [vmem:[%s2216_s0 + $0x78] sm:$0xf0]  ;;  %v1279_v21 = vld [vmem:[%s2216_s0 + $0xb4] sm:$0xf0] }
  0x42   :  { %888 = vmatpush.bf16.msrb.mxu2 %v187_v63  ;;  %v1051_v63 = vor.u32 %v1270_v55, %v1050_v54  ;;  %v1063_v6 = vor.u32 %v1267_v60, %v1060_v61  ;;  %v1275_v22 = vld [vmem:[%s2216_s0 + $0x9c] sm:$0xf] }
  0x43   :  { %605 = vmatmul.bf16.gmra.mxu0 %v1067_v48  ;;  %v1162_v48 = vld [vmem:[%s2216_s0 + $0x140] sm:$0xf]  ;;  %937 = vmatpush.bf16.msrb.mxu3 %v195_v4  ;;  %v1092_v23 = vld [vmem:[%s2216_s0 + $0xb8] sm:$0xf0] }
  0x44   :  { %654 = vmatmul.bf16.gmra.mxu1 %v1071_v49  ;;  %v1300_v49 = vld [vmem:[%s2216_s0 + $0x15c] sm:$0xf0] }
  0x45   :  { %703 = vmatmul.bf16.gmra.mxu2 %v1075_v50  ;;  %v1296_v50 = vld [vmem:[%s2216_s0 + $0x144] sm:$0xf]  ;;  %v1163_v56 = vor.u32 %v1300_v49, %v1162_v48 }
  0x46   :  { %752 = vmatmul.bf16.gmra.mxu3 %v1079_v51  ;;  %v1164_v51 = vld [vmem:[%s2216_s0 + $0x160] sm:$0xf0] }
  0x47   :  { %v1167_v57 = vor.u32 %v1296_v50, %v1164_v51 }
  0x53   :  { %610 = vmatmul.bf16.gmra.mxu0 %v1099_v8  ;;  %v1194_v8 = vld [vmem:[%s2216_s0 + $0x180] sm:$0xf] }
  0x54   :  { %659 = vmatmul.bf16.gmra.mxu1 %v1103_v9  ;;  %v1308_v9 = vld [vmem:[%s2216_s0 + $0x19c] sm:$0xf0] }
  0x55   :  { %708 = vmatmul.bf16.gmra.mxu2 %v1107_v10  ;;  %v1304_v10 = vld [vmem:[%s2216_s0 + $0x184] sm:$0xf]  ;;  %v1195_v16 = vor.u32 %v1308_v9, %v1194_v8 }
  0x56   :  { %757 = vmatmul.bf16.gmra.mxu3 %v1111_v11  ;;  %v1196_v11 = vld [vmem:[%s2216_s0 + $0x1a0] sm:$0xf0] }
  0x57   :  { %v1199_v17 = vor.u32 %v1304_v10, %v1196_v11 }
  0x63   :  { %615 = vmatmul.bf16.gmra.mxu0 %v1131_v32  ;;  %v1018_v32 = vld [vmem:[%s2216_s0 + $0x10] sm:$0xf] }
  0x64   :  { %664 = vmatmul.bf16.gmra.mxu1 %v1135_v33  ;;  %v1262_v33 = vld [vmem:[%s2216_s0 + $0x2c] sm:$0xf0] }
  0x65   :  { %713 = vmatmul.bf16.gmra.mxu2 %v1139_v34  ;;  %v1258_v34 = vld [vmem:[%s2216_s0 + $0x14] sm:$0xf]  ;;  %v1019_v40 = vor.u32 %v1262_v33, %v1018_v32  ;;  %v1095_v32 = vor.u32 %v1275_v22, %v1092_v23 }
  0x66   :  { %762 = vmatmul.bf16.gmra.mxu3 %v1143_v35  ;;  %v1020_v35 = vld [vmem:[%s2216_s0 + $0x30] sm:$0xf0] }
  0x67   :  { %v1023_v42 = vor.u32 %v1258_v34, %v1020_v35 }
  0x73   :  { %620 = vmatmul.bf16.gmra.mxu0 %v1163_v56  ;;  %v1266_v56 = vld [vmem:[%s2216_s0 + $0x54] sm:$0xf] }
  0x74   :  { %669 = vmatmul.bf16.gmra.mxu1 %v1167_v57  ;;  %v1052_v57 = vld [vmem:[%s2216_s0 + $0x70] sm:$0xf0] }
  0x75   :  { %718 = vmatmul.bf16.gmra.mxu2 %v1171_v58  ;;  %v1058_v58 = vld [vmem:[%s2216_s0 + $0x58] sm:$0xf]  ;;  %v1055_v3 = vor.u32 %v1266_v56, %v1052_v57 }
  0x76   :  { %767 = vmatmul.bf16.gmra.mxu3 %v1175_v59  ;;  %v1271_v59 = vld [vmem:[%s2216_s0 + $0x74] sm:$0xf0] }
  0x77   :  { %v1059_v4 = vor.u32 %v1271_v59, %v1058_v58 }
  0x83   :  { %625 = vmatmul.bf16.gmra.mxu0 %v1195_v16  ;;  %v1082_v16 = vld [vmem:[%s2216_s0 + $0x90] sm:$0xf] }
  0x84   :  { %674 = vmatmul.bf16.gmra.mxu1 %v1199_v17  ;;  %v1278_v17 = vld [vmem:[%s2216_s0 + $0xac] sm:$0xf0] }
  0x85   :  { %723 = vmatmul.bf16.gmra.mxu2 %v1203_v18  ;;  %v1274_v18 = vld [vmem:[%s2216_s0 + $0x94] sm:$0xf]  ;;  %v1083_v25 = vor.u32 %v1278_v17, %v1082_v16 }
  0x86   :  { %772 = vmatmul.bf16.gmra.mxu3 %v1207_v19  ;;  %v1084_v19 = vld [vmem:[%s2216_s0 + $0xb0] sm:$0xf0] }
  0x93   :  { %630 = vmatmul.bf16.gmra.mxu0 %v1227_v28 }
  0x94   :  { %679 = vmatmul.bf16.gmra.mxu1 %v1231_v29  ;;  %v1087_v29 = vor.u32 %v1274_v18, %v1084_v19 }
  0x95   :  { %728 = vmatmul.bf16.gmra.mxu2 %v1235_v30  ;;  %v1091_v30 = vor.u32 %v1279_v21, %v1090_v20 }
  0x96   :  { %777 = vmatmul.bf16.gmra.mxu3 %v1239_v31 }
  0xa0   :  { %v596_v41 = vpop.f32.mrf.mxu0 }
  0xa1   :  { %v645_v44 = vpop.f32.mrf.mxu1 }
  0xa2   :  { %v646_v46 = vadd.f32 %v645_v44, %v596_v41  ;;  %v1282_v44 = vld [vmem:[%s2216_s0 + $0xd4] sm:$0xf] }
  0xa3   :  { %791 = vmatmul.bf16.vlgmr.msrb.gmra.mxu0 %v1019_v40 }
  0xa4   :  { %840 = vmatmul.bf16.vlgmr.msrb.gmra.mxu1 %v1023_v42  ;;  %v1114_v42 = vld [vmem:[%s2216_s0 + $0xd0] sm:$0xf] }
  0xa5   :  { %889 = vmatmul.bf16.vlgmr.msrb.gmra.mxu2 %v1027_v43  ;;  %v1286_v43 = vld [vmem:[%s2216_s0 + $0xec] sm:$0xf0] }
  0xa6   :  { %938 = vmatmul.bf16.vlgmr.msrb.gmra.mxu3 %v1031_v45  ;;  %v1116_v45 = vld [vmem:[%s2216_s0 + $0xf0] sm:$0xf0] }
  0xa7   :  { %v1119_v56 = vor.u32 %v1282_v44, %v1116_v45 }
  0xa8   :  { %v694_v47 = vpop.f32.mrf.mxu2  ;;  %v598_v50 = vpop.f32.mrf.mxu0 }
  0xa9   :  { %v695_v48 = vadd.f32 %v694_v47, %v646_v46  ;;  %v743_v49 = vpop.f32.mrf.mxu3  ;;  %v647_v51 = vpop.f32.mrf.mxu1  ;;  %v1122_v46 = vld [vmem:[%s2216_s0 + $0xd8] sm:$0xf] }
  0xaa   :  { %v648_v53 = vadd.f32 %v647_v51, %v598_v50  ;;  %v1287_v47 = vld [vmem:[%s2216_s0 + $0xf4] sm:$0xf0]  ;;  %v1115_v51 = vor.u32 %v1286_v43, %v1114_v42  ;;  %v1188_v42 = vld [vmem:[%s2216_s0 + $0x178] sm:$0xf0] }
  0xab   :  { %v1935_v52 = vadd.f32 %v743_v49, %v695_v48  ;;  %v1283_v48 = vld [vmem:[%s2216_s0 + $0xdc] sm:$0xf]  ;;  %v1123_v57 = vor.u32 %v1287_v47, %v1122_v46 }
  0xac   :  { %v1124_v49 = vld [vmem:[%s2216_s0 + $0xf8] sm:$0xf0] }
  0xad   :  { %v1127_v59 = vor.u32 %v1283_v48, %v1124_v49 }
  0xb0   :  { %v696_v62 = vpop.f32.mrf.mxu2  ;;  %v601_v2 = vpop.f32.mrf.mxu0 }
  0xb1   :  { %v697_v0 = vadd.f32 %v696_v62, %v648_v53  ;;  %v745_v1 = vpop.f32.mrf.mxu3  ;;  %v650_v5 = vpop.f32.mrf.mxu1 }
  0xb2   :  { %v651_v8 = vadd.f32 %v650_v5, %v601_v2  ;;  %v1146_v5 = vld [vmem:[%s2216_s0 + $0x110] sm:$0xf] }
  0xb3   :  { %v1961_v7 = vadd.f32 %v745_v1, %v697_v0  ;;  %796 = vmatmul.bf16.gmra.mxu0 %v1051_v63 }
  0xb4   :  { %845 = vmatmul.bf16.gmra.mxu1 %v1055_v3 }
  0xb5   :  { %894 = vmatmul.bf16.gmra.mxu2 %v1059_v4 }
  0xb6   :  { %943 = vmatmul.bf16.gmra.mxu3 %v1063_v6  ;;  %v1294_v6 = vld [vmem:[%s2216_s0 + $0x12c] sm:$0xf0] }
  0xb7   :  { %v1147_v16 = vor.u32 %v1294_v6, %v1146_v5  ;;  %v1311_v5 = vld [vmem:[%s2216_s0 + $0x1b4] sm:$0xf0]  ;;  %v1307_v6 = vld [vmem:[%s2216_s0 + $0x19c] sm:$0xf] }
  0xb8   :  { %v699_v9 = vpop.f32.mrf.mxu2  ;;  %v603_v12 = vpop.f32.mrf.mxu0 }
  0xb9   :  { %v700_v10 = vadd.f32 %v699_v9, %v651_v8  ;;  %v748_v11 = vpop.f32.mrf.mxu3  ;;  %v652_v13 = vpop.f32.mrf.mxu1  ;;  %v1290_v8 = vld [vmem:[%s2216_s0 + $0x114] sm:$0xf] }
  0xba   :  { %v653_v15 = vadd.f32 %v652_v13, %v603_v12  ;;  %v1148_v9 = vld [vmem:[%s2216_s0 + $0x130] sm:$0xf0]  ;;  %v1291_v12 = vld [vmem:[%s2216_s0 + $0x11c] sm:$0xf] }
  0xbb   :  { %v1963_v14 = vadd.f32 %v748_v11, %v700_v10  ;;  %v1154_v10 = vld [vmem:[%s2216_s0 + $0x118] sm:$0xf]  ;;  %v1156_v13 = vld [vmem:[%s2216_s0 + $0x138] sm:$0xf0]  ;;  %v1151_v20 = vor.u32 %v1290_v8, %v1148_v9 }
  0xbc   :  { %v1295_v11 = vld [vmem:[%s2216_s0 + $0x134] sm:$0xf0]  ;;  %v1159_v23 = vor.u32 %v1291_v12, %v1156_v13  ;;  %v1220_v8 = vld [vmem:[%s2216_s0 + $0x1b8] sm:$0xf0] }
  0xbd   :  { %v1155_v21 = vor.u32 %v1295_v11, %v1154_v10 }
  0xc0   :  { %v701_v24 = vpop.f32.mrf.mxu2  ;;  %v606_v28 = vpop.f32.mrf.mxu0 }
  0xc1   :  { %v702_v26 = vadd.f32 %v701_v24, %v653_v15  ;;  %v750_v27 = vpop.f32.mrf.mxu3  ;;  %v655_v31 = vpop.f32.mrf.mxu1 }
  0xc2   :  { %v656_v34 = vadd.f32 %v655_v31, %v606_v28 }
  0xc3   :  { %v1989_v33 = vadd.f32 %v750_v27, %v702_v26  ;;  %801 = vmatmul.bf16.gmra.mxu0 %v1083_v25 }
  0xc4   :  { %850 = vmatmul.bf16.gmra.mxu1 %v1087_v29 }
  0xc5   :  { %899 = vmatmul.bf16.gmra.mxu2 %v1091_v30 }
  0xc6   :  { %948 = vmatmul.bf16.gmra.mxu3 %v1095_v32 }
  0xc8   :  { %v704_v35 = vpop.f32.mrf.mxu2  ;;  %v608_v38 = vpop.f32.mrf.mxu0 }
  0xc9   :  { %v705_v36 = vadd.f32 %v704_v35, %v656_v34  ;;  %v753_v37 = vpop.f32.mrf.mxu3  ;;  %v657_v39 = vpop.f32.mrf.mxu1  ;;  %v1178_v34 = vld [vmem:[%s2216_s0 + $0x150] sm:$0xf] }
  0xca   :  { %v658_v41 = vadd.f32 %v657_v39, %v608_v38  ;;  %v1302_v35 = vld [vmem:[%s2216_s0 + $0x16c] sm:$0xf0]  ;;  %v1186_v38 = vld [vmem:[%s2216_s0 + $0x158] sm:$0xf] }
  0xcb   :  { %v1991_v40 = vadd.f32 %v753_v37, %v705_v36  ;;  %v1298_v36 = vld [vmem:[%s2216_s0 + $0x154] sm:$0xf]  ;;  %v1303_v39 = vld [vmem:[%s2216_s0 + $0x174] sm:$0xf0]  ;;  %v1179_v44 = vor.u32 %v1302_v35, %v1178_v34 }
  0xcc   :  { %v1180_v37 = vld [vmem:[%s2216_s0 + $0x170] sm:$0xf0]  ;;  %v1187_v49 = vor.u32 %v1303_v39, %v1186_v38  ;;  %v1250_v35 = vld [vmem:[%s2216_s0 + $0x1d8] sm:$0xf]  ;;  %v1252_v38 = vld [vmem:[%s2216_s0 + $0x1f8] sm:$0xf0] }
  0xcd   :  { %v1183_v48 = vor.u32 %v1298_v36, %v1180_v37  ;;  %v1244_v34 = vld [vmem:[%s2216_s0 + $0x1f0] sm:$0xf0]  ;;  %v1319_v36 = vld [vmem:[%s2216_s0 + $0x1f4] sm:$0xf0]  ;;  %v1315_v37 = vld [vmem:[%s2216_s0 + $0x1dc] sm:$0xf] }
  0xd0   :  { %v706_v50 = vpop.f32.mrf.mxu2  ;;  %v611_v55 = vpop.f32.mrf.mxu0 }
  0xd1   :  { %v707_v53 = vadd.f32 %v706_v50, %v658_v41  ;;  %v755_v54 = vpop.f32.mrf.mxu3  ;;  %v660_v58 = vpop.f32.mrf.mxu1  ;;  %v1299_v41 = vld [vmem:[%s2216_s0 + $0x15c] sm:$0xf] }
  0xd2   :  { %v661_v61 = vadd.f32 %v660_v58, %v611_v55 }
  0xd3   :  { %v2017_v60 = vadd.f32 %v755_v54, %v707_v53  ;;  %806 = vmatmul.bf16.gmra.mxu0 %v1115_v51  ;;  %v1191_v51 = vor.u32 %v1299_v41, %v1188_v42 }
  0xd4   :  { %855 = vmatmul.bf16.gmra.mxu1 %v1119_v56 }
  0xd5   :  { %904 = vmatmul.bf16.gmra.mxu2 %v1123_v57 }
  0xd6   :  { %953 = vmatmul.bf16.gmra.mxu3 %v1127_v59 }
  0xd8   :  { %v709_v62 = vpop.f32.mrf.mxu2  ;;  %v613_v1 = vpop.f32.mrf.mxu0 }
  0xd9   :  { %v710_v63 = vadd.f32 %v709_v62, %v661_v61  ;;  %v758_v0 = vpop.f32.mrf.mxu3  ;;  %v662_v2 = vpop.f32.mrf.mxu1 }
  0xda   :  { %v663_v4 = vadd.f32 %v662_v2, %v613_v1  ;;  %v1306_v1 = vld [vmem:[%s2216_s0 + $0x194] sm:$0xf] }
  0xdb   :  { %v2019_v3 = vadd.f32 %v758_v0, %v710_v63  ;;  %v1210_v63 = vld [vmem:[%s2216_s0 + $0x190] sm:$0xf]  ;;  %v1212_v2 = vld [vmem:[%s2216_s0 + $0x1b0] sm:$0xf0] }
  0xdc   :  { %v1310_v0 = vld [vmem:[%s2216_s0 + $0x1ac] sm:$0xf0] }
  0xdd   :  { %v1211_v10 = vor.u32 %v1310_v0, %v1210_v63 }
  0xe0   :  { %v711_v15 = vpop.f32.mrf.mxu2  ;;  %v616_v19 = vpop.f32.mrf.mxu0 }
  0xe1   :  { %v712_v17 = vadd.f32 %v711_v15, %v663_v4  ;;  %v760_v18 = vpop.f32.mrf.mxu3  ;;  %v665_v22 = vpop.f32.mrf.mxu1  ;;  %v1218_v4 = vld [vmem:[%s2216_s0 + $0x198] sm:$0xf]  ;;  %v1215_v15 = vor.u32 %v1306_v1, %v1212_v2 }
  0xe2   :  { %v666_v25 = vadd.f32 %v665_v22, %v616_v19 }
  0xe3   :  { %v2045_v24 = vadd.f32 %v760_v18, %v712_v17  ;;  %811 = vmatmul.bf16.gmra.mxu0 %v1147_v16  ;;  %v1219_v16 = vor.u32 %v1311_v5, %v1218_v4  ;;  %v1223_v18 = vor.u32 %v1307_v6, %v1220_v8 }
  0xe4   :  { %860 = vmatmul.bf16.gmra.mxu1 %v1151_v20 }
  0xe5   :  { %909 = vmatmul.bf16.gmra.mxu2 %v1155_v21 }
  0xe6   :  { %958 = vmatmul.bf16.gmra.mxu3 %v1159_v23 }
  0xe8   :  { %v714_v26 = vpop.f32.mrf.mxu2  ;;  %v618_v29 = vpop.f32.mrf.mxu0 }
  0xe9   :  { %v715_v27 = vadd.f32 %v714_v26, %v666_v25  ;;  %v763_v28 = vpop.f32.mrf.mxu3  ;;  %v667_v30 = vpop.f32.mrf.mxu1 }
  0xea   :  { %v668_v32 = vadd.f32 %v667_v30, %v618_v29  ;;  %v1242_v29 = vld [vmem:[%s2216_s0 + $0x1d0] sm:$0xf] }
  0xeb   :  { %v2047_v31 = vadd.f32 %v763_v28, %v715_v27  ;;  %v1318_v30 = vld [vmem:[%s2216_s0 + $0x1ec] sm:$0xf0] }
  0xec   :  { %v1243_v41 = vor.u32 %v1318_v30, %v1242_v29 }
  0xf0   :  { %v716_v43 = vpop.f32.mrf.mxu2  ;;  %v621_v47 = vpop.f32.mrf.mxu0 }
  0xf1   :  { %v717_v45 = vadd.f32 %v716_v43, %v668_v32  ;;  %v765_v46 = vpop.f32.mrf.mxu3  ;;  %v670_v50 = vpop.f32.mrf.mxu1  ;;  %v1314_v32 = vld [vmem:[%s2216_s0 + $0x1d4] sm:$0xf] }
  0xf2   :  { %v671_v54 = vadd.f32 %v670_v50, %v621_v47 }
  0xf3   :  { %v2073_v53 = vadd.f32 %v765_v46, %v717_v45  ;;  %816 = vmatmul.bf16.gmra.mxu0 %v1179_v44  ;;  %v1247_v45 = vor.u32 %v1314_v32, %v1244_v34  ;;  %v1251_v46 = vor.u32 %v1319_v36, %v1250_v35 }
  0xf4   :  { %865 = vmatmul.bf16.gmra.mxu1 %v1183_v48  ;;  %v1255_v48 = vor.u32 %v1315_v37, %v1252_v38 }
  0xf5   :  { %914 = vmatmul.bf16.gmra.mxu2 %v1187_v49 }
  0xf6   :  { %963 = vmatmul.bf16.gmra.mxu3 %v1191_v51 }
  0xf8   :  { %v719_v55 = vpop.f32.mrf.mxu2  ;;  %v623_v58 = vpop.f32.mrf.mxu0 }
  0xf9   :  { %v720_v56 = vadd.f32 %v719_v55, %v671_v54  ;;  %v768_v57 = vpop.f32.mrf.mxu3  ;;  %v672_v59 = vpop.f32.mrf.mxu1 }
  0xfa   :  { %v673_v62 = vadd.f32 %v672_v59, %v623_v58 }
  0xfb   :  { %v2075_v61 = vadd.f32 %v768_v57, %v720_v56 }
 0x100   :  { %v721_v9 = vpop.f32.mrf.mxu2  ;;  %v626_v13 = vpop.f32.mrf.mxu0 }
 0x101   :  { %v722_v11 = vadd.f32 %v721_v9, %v673_v62  ;;  %v770_v12 = vpop.f32.mrf.mxu3  ;;  %v675_v17 = vpop.f32.mrf.mxu1 }
 0x102   :  { %v676_v20 = vadd.f32 %v675_v17, %v626_v13 }
 0x103   :  { %v2101_v19 = vadd.f32 %v770_v12, %v722_v11  ;;  %821 = vmatmul.bf16.gmra.mxu0 %v1211_v10 }
 0x104   :  { %870 = vmatmul.bf16.gmra.mxu1 %v1215_v15 }
 0x105   :  { %919 = vmatmul.bf16.gmra.mxu2 %v1219_v16 }
 0x106   :  { %968 = vmatmul.bf16.gmra.mxu3 %v1223_v18 }
 0x108   :  { %v724_v21 = vpop.f32.mrf.mxu2  ;;  %v628_v25 = vpop.f32.mrf.mxu0 }
 0x109   :  { %v725_v22 = vadd.f32 %v724_v21, %v676_v20  ;;  %v773_v23 = vpop.f32.mrf.mxu3  ;;  %v677_v26 = vpop.f32.mrf.mxu1 }
 0x10a   :  { %v678_v28 = vadd.f32 %v677_v26, %v628_v25 }
 0x10b   :  { %v2103_v27 = vadd.f32 %v773_v23, %v725_v22 }
 0x110   :  { %v726_v39 = vpop.f32.mrf.mxu2  ;;  %v631_v44 = vpop.f32.mrf.mxu0 }
 0x111   :  { %v727_v42 = vadd.f32 %v726_v39, %v678_v28  ;;  %v775_v43 = vpop.f32.mrf.mxu3  ;;  %v680_v47 = vpop.f32.mrf.mxu1 }
 0x112   :  { %v681_v50 = vadd.f32 %v680_v47, %v631_v44 }
 0x113   :  { %v2129_v49 = vadd.f32 %v775_v43, %v727_v42  ;;  %826 = vmatmul.bf16.gmra.mxu0 %v1243_v41 }
 0x114   :  { %875 = vmatmul.bf16.gmra.mxu1 %v1247_v45 }
 0x115   :  { %924 = vmatmul.bf16.gmra.mxu2 %v1251_v46 }
 0x116   :  { %973 = vmatmul.bf16.gmra.mxu3 %v1255_v48 }
 0x118   :  { %v729_v51 = vpop.f32.mrf.mxu2  ;;  %v633_v56 = vpop.f32.mrf.mxu0 }
 0x119   :  { %v730_v54 = vadd.f32 %v729_v51, %v681_v50  ;;  %v778_v55 = vpop.f32.mrf.mxu3  ;;  %v682_v57 = vpop.f32.mrf.mxu1 }
 0x11a   :  { %v683_v59 = vadd.f32 %v682_v57, %v633_v56 }
 0x11b   :  { %v2131_v58 = vadd.f32 %v778_v55, %v730_v54 }
 0x120   :  { %v731_v62 = vpop.f32.mrf.mxu2  ;;  %v792_v1 = vpop.f32.mrf.mxu0 }
 0x121   :  { %v732_v63 = vadd.f32 %v731_v62, %v683_v59  ;;  %v780_v0 = vpop.f32.mrf.mxu3  ;;  %v841_v2 = vpop.f32.mrf.mxu1  ;;  %v793_v5 = vadd.f32 %v792_v1, %v1935_v52 }
 0x123   :  { %v2133_v4 = vadd.f32 %v780_v0, %v732_v63  ;;  %v842_v6 = vadd.f32 %v841_v2, %v793_v5 }
 0x128   :  { %v890_v8 = vpop.f32.mrf.mxu2  ;;  %v794_v11 = vpop.f32.mrf.mxu0 }
 0x129   :  { %v891_v9 = vadd.f32 %v890_v8, %v842_v6  ;;  %v939_v10 = vpop.f32.mrf.mxu3  ;;  %v843_v12 = vpop.f32.mrf.mxu1  ;;  %v795_v15 = vadd.f32 %v794_v11, %v1961_v7 }
 0x12b   :  { %v940_v13 = vadd.f32 %v939_v10, %v891_v9  ;;  %v844_v16 = vadd.f32 %v843_v12, %v795_v15 }
 0x12d   :  { %980 = vst.msk [vmem:[%s2217_s2] sm:$0xff] %vm979_vm0, %v940_v13 }
 0x130   :  { %v892_v17 = vpop.f32.mrf.mxu2  ;;  %v797_v52 = vpop.f32.mrf.mxu0 }
 0x131   :  { %v893_v18 = vadd.f32 %v892_v17, %v844_v16  ;;  %v941_v20 = vpop.f32.mrf.mxu3  ;;  %v846_v21 = vpop.f32.mrf.mxu1  ;;  %v798_v23 = vadd.f32 %v797_v52, %v1963_v14 }
 0x133   :  { %v942_v22 = vadd.f32 %v941_v20, %v893_v18  ;;  %v847_v7 = vadd.f32 %v846_v21, %v798_v23 }
 0x135   :  { %981 = vst.msk [vmem:[%s2217_s2 + $0x8] sm:$0xff] %vm979_vm0, %v942_v22 }
 0x138   :  { %v895_v25 = vpop.f32.mrf.mxu2  ;;  %v799_v29 = vpop.f32.mrf.mxu0 }
 0x139   :  { %v896_v26 = vadd.f32 %v895_v25, %v847_v7  ;;  %v944_v28 = vpop.f32.mrf.mxu3  ;;  %v848_v30 = vpop.f32.mrf.mxu1  ;;  %v800_v34 = vadd.f32 %v799_v29, %v1989_v33 }
 0x13b   :  { %v945_v32 = vadd.f32 %v944_v28, %v896_v26  ;;  %v849_v14 = vadd.f32 %v848_v30, %v800_v34 }
 0x13d   :  { %982 = vst.msk [vmem:[%s2217_s2 + $0x10] sm:$0xff] %vm979_vm0, %v945_v32 }
 0x140   :  { %v897_v35 = vpop.f32.mrf.mxu2  ;;  %v802_v38 = vpop.f32.mrf.mxu0 }
 0x141   :  { %v898_v36 = vadd.f32 %v897_v35, %v849_v14  ;;  %v946_v37 = vpop.f32.mrf.mxu3  ;;  %v851_v39 = vpop.f32.mrf.mxu1  ;;  %v803_v42 = vadd.f32 %v802_v38, %v1991_v40 }
 0x143   :  { %v947_v41 = vadd.f32 %v946_v37, %v898_v36  ;;  %v852_v33 = vadd.f32 %v851_v39, %v803_v42 }
 0x145   :  { %983 = vst.msk [vmem:[%s2217_s2 + $0x18] sm:$0xff] %vm979_vm0, %v947_v41 }
 0x148   :  { %v900_v43 = vpop.f32.mrf.mxu2  ;;  %v804_v46 = vpop.f32.mrf.mxu0 }
 0x149   :  { %v901_v44 = vadd.f32 %v900_v43, %v852_v33  ;;  %v949_v45 = vpop.f32.mrf.mxu3  ;;  %v853_v47 = vpop.f32.mrf.mxu1  ;;  %v805_v50 = vadd.f32 %v804_v46, %v2017_v60 }
 0x14b   :  { %v950_v48 = vadd.f32 %v949_v45, %v901_v44  ;;  %v854_v40 = vadd.f32 %v853_v47, %v805_v50 }
 0x14d   :  { %984 = vst.msk [vmem:[%s2217_s2 + $0x20] sm:$0xff] %vm979_vm0, %v950_v48 }
 0x150   :  { %v902_v51 = vpop.f32.mrf.mxu2  ;;  %v807_v56 = vpop.f32.mrf.mxu0 }
 0x151   :  { %v903_v54 = vadd.f32 %v902_v51, %v854_v40  ;;  %v951_v55 = vpop.f32.mrf.mxu3  ;;  %v856_v57 = vpop.f32.mrf.mxu1  ;;  %v808_v62 = vadd.f32 %v807_v56, %v2019_v3 }
 0x153   :  { %v952_v59 = vadd.f32 %v951_v55, %v903_v54  ;;  %v857_v60 = vadd.f32 %v856_v57, %v808_v62 }
 0x155   :  { %985 = vst.msk [vmem:[%s2217_s2 + $0x28] sm:$0xff] %vm979_vm0, %v952_v59 }
 0x158   :  { %v905_v63 = vpop.f32.mrf.mxu2  ;;  %v809_v2 = vpop.f32.mrf.mxu0 }
 0x159   :  { %v906_v0 = vadd.f32 %v905_v63, %v857_v60  ;;  %v954_v1 = vpop.f32.mrf.mxu3  ;;  %v858_v5 = vpop.f32.mrf.mxu1  ;;  %v810_v8 = vadd.f32 %v809_v2, %v2045_v24 }
 0x15b   :  { %v955_v6 = vadd.f32 %v954_v1, %v906_v0  ;;  %v859_v3 = vadd.f32 %v858_v5, %v810_v8 }
 0x15d   :  { %986 = vst.msk [vmem:[%s2217_s2 + $0x30] sm:$0xff] %vm979_vm0, %v955_v6 }
 0x160   :  { %v907_v9 = vpop.f32.mrf.mxu2  ;;  %v812_v12 = vpop.f32.mrf.mxu0 }
 0x161   :  { %v908_v10 = vadd.f32 %v907_v9, %v859_v3  ;;  %v956_v11 = vpop.f32.mrf.mxu3  ;;  %v861_v13 = vpop.f32.mrf.mxu1  ;;  %v813_v16 = vadd.f32 %v812_v12, %v2047_v31 }
 0x163   :  { %v957_v15 = vadd.f32 %v956_v11, %v908_v10  ;;  %v862_v24 = vadd.f32 %v861_v13, %v813_v16 }
 0x165   :  { %987 = vst.msk [vmem:[%s2217_s2 + $0x38] sm:$0xff] %vm979_vm0, %v957_v15 }
 0x168   :  { %v910_v17 = vpop.f32.mrf.mxu2  ;;  %v814_v52 = vpop.f32.mrf.mxu0 }
 0x169   :  { %v911_v18 = vadd.f32 %v910_v17, %v862_v24  ;;  %v959_v20 = vpop.f32.mrf.mxu3  ;;  %v863_v21 = vpop.f32.mrf.mxu1  ;;  %v815_v23 = vadd.f32 %v814_v52, %v2073_v53 }
 0x16b   :  { %v960_v22 = vadd.f32 %v959_v20, %v911_v18  ;;  %v864_v31 = vadd.f32 %v863_v21, %v815_v23 }
 0x16d   :  { %988 = vst.msk [vmem:[%s2217_s2 + $0x40] sm:$0xff] %vm979_vm0, %v960_v22 }
 0x170   :  { %v912_v7 = vpop.f32.mrf.mxu2  ;;  %v817_v28 = vpop.f32.mrf.mxu0 }
 0x171   :  { %v913_v25 = vadd.f32 %v912_v7, %v864_v31  ;;  %v961_v26 = vpop.f32.mrf.mxu3  ;;  %v866_v29 = vpop.f32.mrf.mxu1  ;;  %v818_v32 = vadd.f32 %v817_v28, %v2075_v61 }
 0x173   :  { %v962_v30 = vadd.f32 %v961_v26, %v913_v25  ;;  %v867_v53 = vadd.f32 %v866_v29, %v818_v32 }
 0x175   :  { %989 = vst.msk [vmem:[%s2217_s2 + $0x48] sm:$0xff] %vm979_vm0, %v962_v30 }
 0x178   :  { %v915_v34 = vpop.f32.mrf.mxu2  ;;  %v819_v36 = vpop.f32.mrf.mxu0 }
 0x179   :  { %v916_v14 = vadd.f32 %v915_v34, %v867_v53  ;;  %v964_v35 = vpop.f32.mrf.mxu3  ;;  %v868_v37 = vpop.f32.mrf.mxu1  ;;  %v820_v39 = vadd.f32 %v819_v36, %v2101_v19 }
 0x17b   :  { %v965_v38 = vadd.f32 %v964_v35, %v916_v14  ;;  %v869_v61 = vadd.f32 %v868_v37, %v820_v39 }
 0x17d   :  { %990 = vst.msk [vmem:[%s2217_s2 + $0x50] sm:$0xff] %vm979_vm0, %v965_v38 }
 0x180   :  { %v917_v41 = vpop.f32.mrf.mxu2  ;;  %v822_v43 = vpop.f32.mrf.mxu0 }
 0x181   :  { %v918_v42 = vadd.f32 %v917_v41, %v869_v61  ;;  %v966_v33 = vpop.f32.mrf.mxu3  ;;  %v871_v44 = vpop.f32.mrf.mxu1  ;;  %v823_v46 = vadd.f32 %v822_v43, %v2103_v27 }
 0x183   :  { %v967_v45 = vadd.f32 %v966_v33, %v918_v42  ;;  %v872_v19 = vadd.f32 %v871_v44, %v823_v46 }
 0x185   :  { %991 = vst.msk [vmem:[%s2217_s2 + $0x58] sm:$0xff] %vm979_vm0, %v967_v45 }
 0x188   :  { %v920_v47 = vpop.f32.mrf.mxu2  ;;  %v824_v40 = vpop.f32.mrf.mxu0 }
 0x189   :  { %v921_v48 = vadd.f32 %v920_v47, %v872_v19  ;;  %v969_v50 = vpop.f32.mrf.mxu3  ;;  %v873_v51 = vpop.f32.mrf.mxu1  ;;  %v825_v55 = vadd.f32 %v824_v40, %v2129_v49 }
 0x18b   :  { %v970_v54 = vadd.f32 %v969_v50, %v921_v48  ;;  %v874_v27 = vadd.f32 %v873_v51, %v825_v55 }
 0x18d   :  { %992 = vst.msk [vmem:[%s2217_s2 + $0x60] sm:$0xff] %vm979_vm0, %v970_v54 }
 0x190   :  { %v922_v56 = vpop.f32.mrf.mxu2  ;;  %v827_v62 = vpop.f32.mrf.mxu0 }
 0x191   :  { %v923_v57 = vadd.f32 %v922_v56, %v874_v27  ;;  %v971_v59 = vpop.f32.mrf.mxu3  ;;  %v828_v63 = vadd.f32 %v827_v62, %v2131_v58  ;;  %v876_v0 = vpop.f32.mrf.mxu1 }
 0x193   :  { %v972_v60 = vadd.f32 %v971_v59, %v923_v57  ;;  %v877_v49 = vadd.f32 %v876_v0, %v828_v63 }
 0x195   :  { %993 = vst.msk [vmem:[%s2217_s2 + $0x68] sm:$0xff] %vm979_vm0, %v972_v60 }
 0x198   :  { %v925_v1 = vpop.f32.mrf.mxu2  ;;  %v829_v6 = vpop.f32.mrf.mxu0 }
 0x199   :  { %v926_v2 = vadd.f32 %v925_v1, %v877_v49  ;;  %v974_v5 = vpop.f32.mrf.mxu3  ;;  %v830_v3 = vadd.f32 %v829_v6, %v2133_v4  ;;  %v878_v58 = vpop.f32.mrf.mxu1 }
 0x19b   :  { %v975_v8 = vadd.f32 %v974_v5, %v926_v2  ;;  %v879_v9 = vadd.f32 %v878_v58, %v830_v3 }
 0x19d   :  { %994 = vst.msk [vmem:[%s2217_s2 + $0x70] sm:$0xff] %vm979_vm0, %v975_v8 }
 0x1a0   :  { %v927_v10 = vpop.f32.mrf.mxu2 }
 0x1a1   :  { %v928_v11 = vadd.f32 %v927_v10, %v879_v9  ;;  %v976_v12 = vpop.f32.mrf.mxu3 }
 0x1a3   :  { %v977_v13 = vadd.f32 %v976_v12, %v928_v11 }
 0x1a5   :  { %995 = vst.msk [vmem:[%s2217_s2 + $0x78] sm:$0xff] %vm979_vm0, %v977_v13 }

</bundles_post_ra>
